<compile_context>
chip_gen: v7x
topology: tpu7x:2x2x1
jax: 0.10.0
libtpu: 0.0.40
codegen_flags: <defaults>
</compile_context>

<pallas_src>
import jax
import jax.numpy as jnp
from jax.experimental import pallas as pl
from jax.experimental.pallas import tpu as pltpu


def _round_up(v, m):
    return ((v + m - 1) // m) * m


def _cdiv(a, b):
    return -(-a // b)


def _device_traits():
    """(megacore, bf16_valu) from the device kind; conservative fallbacks."""
    kind = ""
    try:
        kind = jax.devices()[0].device_kind.lower()
    except Exception:
        pass
    megacore = any(t in kind for t in ("v4", "v5p", "v7"))
    bf16_valu = any(t in kind for t in ("v6", "v7"))
    return megacore, bf16_valu


def _vmem_budget_bytes():
    """VMEM budget for this kernel, with headroom for compiler scratch."""
    physical = 64 * 1024 * 1024  # conservative default (v7x)
    try:
        info = pltpu.get_tpu_info()
        cap = getattr(info, "vmem_capacity_bytes", None)
        if cap:
            physical = int(cap)
    except Exception:
        try:
            kind = jax.devices()[0].device_kind.lower()
            if "v5" in kind or "v6" in kind:
                physical = 128 * 1024 * 1024
        except Exception:
            pass
    if physical >= 128 * 1024 * 1024:
        return 100 * 1024 * 1024                      # v5e / v6e
    return max(physical - 20 * 1024 * 1024, physical * 3 // 4)   # v7x: ~48 MiB


def _choose_tiles(B, S, c_in, c_outs, x_itemsize, cmp_itemsize, tail_itemsize,
                  vmem_budget, num_cores):
    """Pick (tb, tile_s): batch block and spatial (lane) tile."""
    weight_bytes = 0
    inter_cols = 0          # live intermediate bytes per spatial column per batch row
    prev = c_in
    for oc in c_outs:
        weight_bytes += oc * prev * cmp_itemsize + oc * tail_itemsize
        inter_cols = max(inter_cols, prev * cmp_itemsize + oc * 4)  # operand + f32 acc
        prev = oc
    # input & output tiles are double-buffered by the Pallas pipeline
    per_col_row = 2 * c_in * x_itemsize + 2 * c_outs[-1] * x_itemsize + inter_cols
    avail = max(int(vmem_budget) - 2 * weight_bytes, 1)

    min_t = min(S, 128)
    # Fold the batch into each grid step (fewer, bigger steps); cap the unroll.
    tb = min(B, 32)
    while tb > 1 and tb * per_col_row * min_t > avail:
        tb = (tb + 1) // 2

    t = avail // max(tb * per_col_row, 1)
    t = int(min(t, 32768))           # no artificial 2048 cap; VMEM is the limit
    t = max(t, 128)
    if S <= t:
        if num_cores > 1 and S >= num_cores * 256:
            # megacore (v7x): keep >= num_cores parallel spatial steps
            return tb, min(_round_up(_cdiv(S, num_cores), 256), S)
        return tb, S                 # full extent: always a legal block dim
    t = (t // 256) * 256 if t >= 256 else 128
    # Balance the trailing partial tile so the last step is not nearly empty.
    n_steps = max(_cdiv(S, t), num_cores)
    t_bal = _round_up(_cdiv(S, n_steps), 256)
    return tb, max(128, min(t, t_bal))


def _make_mlp_kernel(num_layers, last_relu, compute_dtype, tail_dtype,
                     mxu_precision):
    """Per grid step: for each batch row in the block, apply all layers."""

    def kernel(*refs):
        x_ref = refs[0]
        o_ref = refs[-1]
        wb = refs[1:-1]                       # (w0, b0, w1, b1, ...)
        tb = x_ref.shape[0]
        for bi in range(tb):                  # static unroll over the batch block
            h = x_ref[bi]                     # [C_in, tile_s]: channels->sublanes
            if h.dtype != compute_dtype:
                h = h.astype(compute_dtype)
            for i in range(num_layers):
                w = wb[2 * i][...]            # [C_out_i, C_in_i]
                b = wb[2 * i + 1][...]        # [C_out_i, 1] in tail_dtype
                acc = jnp.dot(w, h, preferred_element_type=jnp.float32,
                              precision=mxu_precision)
                acc = acc.astype(tail_dtype) + b
                if i < num_layers - 1 or last_relu:
                    acc = jnp.maximum(acc, 0)
                h = acc.astype(compute_dtype) if i < num_layers - 1 else acc
            o_ref[bi] = h.astype(o_ref.dtype)

    return kernel


def shared_mlp_pallas(x3, weights, biases, *, last_relu=True, matmul_dtype=None):
    """Apply the shared MLP to x3 of shape [B, C_in, S] (channels-first).

    weights[i]: [C_out_i, C_in_i]   (PyTorch conv-weight layout, squeezed)
    biases[i]:  [C_out_i, 1]
    matmul_dtype: optional override of the MXU operand dtype (e.g. jnp.bfloat16
      to keep v5e off the slow f32 multi-pass path; quantizes weights).
    Returns [B, C_out_last, S] in x3.dtype.
    """
    B, C, S = x3.shape
    num_layers = len(weights)
    c_outs = [int(w.shape[0]) for w in weights]
    c_out = c_outs[-1]

    megacore, bf16_valu = _device_traits()
    num_cores = 2 if megacore else 1

    if matmul_dtype is not None:
        compute_dtype = jnp.dtype(matmul_dtype)
    else:
        compute_dtype = jnp.dtype(
            jnp.bfloat16 if x3.dtype == jnp.bfloat16 else jnp.float32)
    # Elementwise tail (bias+ReLU) in bf16 only where the VPU supports it.
    bf16_tail = (compute_dtype == jnp.bfloat16) and bf16_valu
    tail_dtype = jnp.bfloat16 if bf16_tail else jnp.float32
    # f32 matmuls: force full precision so results match an exact f32 reference.
    mxu_precision = (jax.lax.Precision.HIGHEST
                     if compute_dtype == jnp.float32
                     else jax.lax.Precision.DEFAULT)

    ws = [w.astype(compute_dtype) for w in weights]
    bs = [b.astype(tail_dtype) for b in biases]

    vmem_budget = _vmem_budget_bytes()
    x_itemsize = jnp.dtype(x3.dtype).itemsize
    tb, tile_s = _choose_tiles(
        B, S, C, c_outs, x_itemsize, compute_dtype.itemsize,
        jnp.dtype(tail_dtype).itemsize, vmem_budget, num_cores)

    grid = (pl.cdiv(B, tb), pl.cdiv(S, tile_s))
    kernel = _make_mlp_kernel(num_layers, last_relu, compute_dtype, tail_dtype,
                              mxu_precision)

    flops = 2 * B * S * sum(int(w.shape[0]) * int(w.shape[1]) for w in weights)
    bytes_accessed = (
        B * S * C * x_itemsize
        + B * S * c_out * x_itemsize
        + sum(int(w.size) * compute_dtype.itemsize for w in ws)
        + sum(int(b.size) * jnp.dtype(tail_dtype).itemsize for b in bs)
    )
    cost = pl.CostEstimate(flops=flops, transcendentals=0,
                           bytes_accessed=bytes_accessed)

    in_specs = [pl.BlockSpec((tb, C, tile_s), lambda bi, si: (bi, 0, si))]
    for w, bias in zip(ws, bs):
        # grid-invariant weights/biases: resident in VMEM, no re-DMA across steps
        in_specs.append(pl.BlockSpec(w.shape, lambda bi, si: (0, 0)))
        in_specs.append(pl.BlockSpec(bias.shape, lambda bi, si: (0, 0)))
    out_spec = pl.BlockSpec((tb, c_out, tile_s), lambda bi, si: (bi, 0, si))

    args = [x3]
    for w, b in zip(ws, bs):
        args.extend([w, b])

    return pl.pallas_call(
        kernel,
        out_shape=jax.ShapeDtypeStruct((B, c_out, S), x3.dtype),
        grid_spec=pltpu.PrefetchScalarGridSpec(
            num_scalar_prefetch=0,
            grid=grid,
            in_specs=in_specs,
            out_specs=out_spec,
        ),
        compiler_params=pltpu.CompilerParams(
            dimension_semantics=("parallel", "parallel"),
            vmem_limit_bytes=int(vmem_budget),
        ),
        cost_estimate=cost,
    )(*args)


class SharedMLPPallas:
    """JAX/Pallas port of the PyTorch SharedMLP (Conv1d/Conv2d 1x1 + ReLU)."""

    def __init__(self, in_channels, out_channels, dim=2, last_relu=True,
                 last_bn=True, key=None, matmul_dtype=None):
        if dim not in (1, 2):
            raise ValueError
        if not isinstance(out_channels, (list, tuple)):
            out_channels = [out_channels]
        if key is None:
            key = jax.random.PRNGKey(0)
        self.dim = dim
        self.last_relu = last_relu
        self.matmul_dtype = matmul_dtype
        # last_bn kept for signature parity: the PyTorch module never appends BN.
        # TODO(synk): BatchNorm is constructed but never added to `layers` in the
        # reference module, so it is intentionally not applied here.

        self.weights = []  # each [C_out_pad, C_in_prev] (PyTorch layout, zero-padded)
        self.biases = []   # each [C_out_pad, 1]
        n_layers = len(out_channels)
        logical_prev = in_channels
        stored_prev = in_channels
        for i, oc in enumerate(out_channels):
            is_last = (i == n_layers - 1)
            # pad hidden widths to sublane multiples (exact: padded channels are 0)
            oc_store = oc if is_last else _round_up(oc, 8)
            key, wk, bk = jax.random.split(key, 3)
            # PyTorch Conv default init: U(-1/sqrt(fan_in), 1/sqrt(fan_in))
            bound = 1.0 / (logical_prev ** 0.5)
            w_real = jax.random.uniform(wk, (oc, logical_prev), jnp.float32,
                                        -bound, bound)
            b_real = jax.random.uniform(bk, (oc, 1), jnp.float32, -bound, bound)
            w = jnp.zeros((oc_store, stored_prev), jnp.float32)
            w = w.at[:oc, :logical_prev].set(w_real)
            b = jnp.zeros((oc_store, 1), jnp.float32).at[:oc, :].set(b_real)
            self.weights.append(w)
            self.biases.append(b)
            logical_prev = oc
            stored_prev = oc_store
        self.out_channels = out_channels[-1]

    def _apply(self, x):
        # x: NCHW (dim=2) or NCL (dim=1).  Only free reshapes — no transposes.
        if self.dim == 2:
            b, c, h, w = x.shape
            x3 = x.reshape(b, c, h * w)
        else:
            b, c, l = x.shape
            x3 = x

        y3 = shared_mlp_pallas(x3, self.weights, self.biases,
                               last_relu=self.last_relu,
                               matmul_dtype=self.matmul_dtype)

        if self.dim == 2:
            return y3.reshape(b, self.out_channels, h, w)
        return y3

    def __call__(self, inputs):
        if isinstance(inputs, (list, tuple)):
            return (self._apply(inputs[0]), *inputs[1:])
        return self._apply(inputs)


def _reference(x, weights, biases, last_relu):
    """Pure-JAX reference of the 1x1-conv MLP (channels-first, any spatial rank)."""
    shp = x.shape
    b, c = shp[0], shp[1]
    r = x.reshape(b, c, -1).astype(jnp.float32)
    n = len(weights)
    for i, (wt, bsx) in enumerate(zip(weights, biases)):
        r = jnp.einsum('oc,bcs->bos', wt.astype(jnp.float32), r,
                       precision=jax.lax.Precision.HIGHEST) \
            + bsx[None].astype(jnp.float32)
        if i < n - 1 or last_relu:
            r = jnp.maximum(r, 0.0)
    return r.reshape(b, -1, *shp[2:])


if __name__ == "__main__":
    key = jax.random.PRNGKey(0)
    key, xk = jax.random.split(key)

    # small shapes: batch=2, in_channels=4, spatial=16x16, hidden=[32, 8]
    B, C, H, W = 2, 4, 16, 16
    x = jax.random.normal(xk, (B, C, H, W), dtype=jnp.float32)

    mlp = SharedMLPPallas(in_channels=C, out_channels=[32, 8], dim=2,
                          last_relu=True, key=key)

    y = jax.block_until_ready(mlp(x))

    # also exercise the tuple-passthrough branch of forward()
    extra = jnp.arange(4, dtype=jnp.float32)
    y_tup = mlp((x, extra))
    jax.block_until_ready(y_tup[0])

    y_ref = _reference(x, mlp.weights, mlp.biases, mlp.last_relu)
    assert y.shape == (B, 8, H, W)
    assert jnp.allclose(y, y_ref, atol=1e-5, rtol=1e-5)
    assert jnp.allclose(y_tup[0], y_ref, atol=1e-5, rtol=1e-5)
    assert jnp.array_equal(y_tup[1], extra)

    # also exercise the dim=1 (Conv1d) path with a single int out_channels
    key, xk1 = jax.random.split(key)
    mlp1 = SharedMLPPallas(in_channels=C, out_channels=16, dim=1,
                           last_relu=False, key=key)
    x1 = jax.random.normal(xk1, (2, C, 8), dtype=jnp.float32)
    y1 = jax.block_until_ready(mlp1(x1))
    y1_ref = _reference(x1, mlp1.weights, mlp1.biases, mlp1.last_relu)
    assert y1.shape == (2, 16, 8)
    assert jnp.allclose(y1, y1_ref, atol=1e-5, rtol=1e-5)

    print("KERNEL_OK")
</pallas_src>

<mosaic_0001>
module attributes {stable_mosaic.version = 11 : i64} {
  func.func @kernel(%arg0: i32, %arg1: i32, %arg2: memref<2x4x256xf32, #tpu.memory_space<vmem>>, %arg3: memref<32x4xf32, #tpu.memory_space<vmem>>, %arg4: memref<32x1xf32, #tpu.memory_space<vmem>>, %arg5: memref<8x32xf32, #tpu.memory_space<vmem>>, %arg6: memref<8x1xf32, #tpu.memory_space<vmem>>, %arg7: memref<2x8x256xf32, #tpu.memory_space<vmem>>) attributes {dimension_semantics = [#tpu.dimension_semantics<parallel>, #tpu.dimension_semantics<parallel>], iteration_bounds = array<i64: 1, 1>, scalar_prefetch = 0 : i64, scratch_operands = 0 : i64, tpu.core_type = #tpu.core_type<tc>, window_params = [{transform_indices = @transform_0, window_bounds = array<i64: 2, 4, 256>}, {pipeline_mode = #tpu.pipeline_mode<synchronous>, transform_indices = @transform_1, window_bounds = array<i64: 32, 4>}, {pipeline_mode = #tpu.pipeline_mode<synchronous>, transform_indices = @transform_2, window_bounds = array<i64: 32, 1>}, {pipeline_mode = #tpu.pipeline_mode<synchronous>, transform_indices = @transform_3, window_bounds = array<i64: 8, 32>}, {pipeline_mode = #tpu.pipeline_mode<synchronous>, transform_indices = @transform_4, window_bounds = array<i64: 8, 1>}, {transform_indices = @transform_5, window_bounds = array<i64: 2, 8, 256>}]} {
    %c0 = arith.constant 0 : index
    %c0_0 = arith.constant 0 : index
    %c0_1 = arith.constant 0 : index
    %0 = vector.load %arg2[%c0, %c0_0, %c0_1] : memref<2x4x256xf32, #tpu.memory_space<vmem>>, vector<1x4x256xf32>
    %1 = vector.shape_cast %0 : vector<1x4x256xf32> to vector<4x256xf32>
    %c0_2 = arith.constant 0 : index
    %c0_3 = arith.constant 0 : index
    %2 = vector.load %arg3[%c0_2, %c0_3] : memref<32x4xf32, #tpu.memory_space<vmem>>, vector<32x4xf32>
    %c0_4 = arith.constant 0 : index
    %c0_5 = arith.constant 0 : index
    %3 = vector.load %arg4[%c0_4, %c0_5] : memref<32x1xf32, #tpu.memory_space<vmem>>, vector<32x1xf32>
    %cst = arith.constant dense<0.000000e+00> : vector<32x256xf32>
    %4 = tpu.matmul %2, %1, %cst {dimension_numbers = #tpu.dot_dimension_numbers<[1], [0], [0], [1], [0, 0, 1, 1], [], []>, precision = #tpu.contract_precision<fp32>} : vector<32x4xf32>, vector<4x256xf32>, vector<32x256xf32> -> vector<32x256xf32>
    %5 = vector.broadcast %3 : vector<32x1xf32> to vector<32x256xf32>
    %6 = arith.addf %4, %5 : vector<32x256xf32>
    %cst_6 = arith.constant 0.000000e+00 : f32
    %7 = vector.broadcast %cst_6 : f32 to vector<32x256xf32>
    %8 = arith.maximumf %6, %7 : vector<32x256xf32>
    %c0_7 = arith.constant 0 : index
    %c0_8 = arith.constant 0 : index
    %9 = vector.load %arg5[%c0_7, %c0_8] : memref<8x32xf32, #tpu.memory_space<vmem>>, vector<8x32xf32>
    %c0_9 = arith.constant 0 : index
    %c0_10 = arith.constant 0 : index
    %10 = vector.load %arg6[%c0_9, %c0_10] : memref<8x1xf32, #tpu.memory_space<vmem>>, vector<8x1xf32>
    %cst_11 = arith.constant dense<0.000000e+00> : vector<8x256xf32>
    %11 = tpu.matmul %9, %8, %cst_11 {dimension_numbers = #tpu.dot_dimension_numbers<[1], [0], [0], [1], [0, 0, 1, 1], [], []>, precision = #tpu.contract_precision<fp32>} : vector<8x32xf32>, vector<32x256xf32>, vector<8x256xf32> -> vector<8x256xf32>
    %12 = vector.broadcast %10 : vector<8x1xf32> to vector<8x256xf32>
    %13 = arith.addf %11, %12 : vector<8x256xf32>
    %cst_12 = arith.constant 0.000000e+00 : f32
    %14 = vector.broadcast %cst_12 : f32 to vector<8x256xf32>
    %15 = arith.maximumf %13, %14 : vector<8x256xf32>
    %c0_13 = arith.constant 0 : index
    %c0_14 = arith.constant 0 : index
    %c0_15 = arith.constant 0 : index
    %16 = vector.load %arg7[%c0_13, %c0_14, %c0_15] : memref<2x8x256xf32, #tpu.memory_space<vmem>>, vector<1x8x256xf32>
    %17 = vector.shape_cast %16 : vector<1x8x256xf32> to vector<8x256xf32>
    %18 = vector.shape_cast %15 : vector<8x256xf32> to vector<1x8x256xf32>
    tpu.vector_store %arg7[%c0_13, %c0_14, %c0_15], %18 {strides = array<i32>} : memref<2x8x256xf32, #tpu.memory_space<vmem>>, vector<1x8x256xf32>,
    %c1 = arith.constant 1 : index
    %c0_16 = arith.constant 0 : index
    %c0_17 = arith.constant 0 : index
    %19 = vector.load %arg2[%c1, %c0_16, %c0_17] : memref<2x4x256xf32, #tpu.memory_space<vmem>>, vector<1x4x256xf32>
    %20 = vector.shape_cast %19 : vector<1x4x256xf32> to vector<4x256xf32>
    %c0_18 = arith.constant 0 : index
    %c0_19 = arith.constant 0 : index
    %21 = vector.load %arg3[%c0_18, %c0_19] : memref<32x4xf32, #tpu.memory_space<vmem>>, vector<32x4xf32>
    %c0_20 = arith.constant 0 : index
    %c0_21 = arith.constant 0 : index
    %22 = vector.load %arg4[%c0_20, %c0_21] : memref<32x1xf32, #tpu.memory_space<vmem>>, vector<32x1xf32>
    %cst_22 = arith.constant dense<0.000000e+00> : vector<32x256xf32>
    %23 = tpu.matmul %21, %20, %cst_22 {dimension_numbers = #tpu.dot_dimension_numbers<[1], [0], [0], [1], [0, 0, 1, 1], [], []>, precision = #tpu.contract_precision<fp32>} : vector<32x4xf32>, vector<4x256xf32>, vector<32x256xf32> -> vector<32x256xf32>
    %24 = vector.broadcast %22 : vector<32x1xf32> to vector<32x256xf32>
    %25 = arith.addf %23, %24 : vector<32x256xf32>
    %cst_23 = arith.constant 0.000000e+00 : f32
    %26 = vector.broadcast %cst_23 : f32 to vector<32x256xf32>
    %27 = arith.maximumf %25, %26 : vector<32x256xf32>
    %c0_24 = arith.constant 0 : index
    %c0_25 = arith.constant 0 : index
    %28 = vector.load %arg5[%c0_24, %c0_25] : memref<8x32xf32, #tpu.memory_space<vmem>>, vector<8x32xf32>
    %c0_26 = arith.constant 0 : index
    %c0_27 = arith.constant 0 : index
    %29 = vector.load %arg6[%c0_26, %c0_27] : memref<8x1xf32, #tpu.memory_space<vmem>>, vector<8x1xf32>
    %cst_28 = arith.constant dense<0.000000e+00> : vector<8x256xf32>
    %30 = tpu.matmul %28, %27, %cst_28 {dimension_numbers = #tpu.dot_dimension_numbers<[1], [0], [0], [1], [0, 0, 1, 1], [], []>, precision = #tpu.contract_precision<fp32>} : vector<8x32xf32>, vector<32x256xf32>, vector<8x256xf32> -> vector<8x256xf32>
    %31 = vector.broadcast %29 : vector<8x1xf32> to vector<8x256xf32>
    %32 = arith.addf %30, %31 : vector<8x256xf32>
    %cst_29 = arith.constant 0.000000e+00 : f32
    %33 = vector.broadcast %cst_29 : f32 to vector<8x256xf32>
    %34 = arith.maximumf %32, %33 : vector<8x256xf32>
    %c1_30 = arith.constant 1 : index
    %c0_31 = arith.constant 0 : index
    %c0_32 = arith.constant 0 : index
    %35 = vector.load %arg7[%c1_30, %c0_31, %c0_32] : memref<2x8x256xf32, #tpu.memory_space<vmem>>, vector<1x8x256xf32>
    %36 = vector.shape_cast %35 : vector<1x8x256xf32> to vector<8x256xf32>
    %37 = vector.shape_cast %34 : vector<8x256xf32> to vector<1x8x256xf32>
    tpu.vector_store %arg7[%c1_30, %c0_31, %c0_32], %37 {strides = array<i32>} : memref<2x8x256xf32, #tpu.memory_space<vmem>>, vector<1x8x256xf32>,
    return
  }
  func.func @transform_0(%arg0: i32, %arg1: i32) -> (i32, i32, i32) {
    %c0_i32 = arith.constant 0 : i32
    %c0_i32_0 = arith.constant 0 : i32
    return %arg0, %c0_i32, %arg1 : i32, i32, i32
  }
  func.func @transform_1(%arg0: i32, %arg1: i32) -> (i32, i32) {
    %c0_i32 = arith.constant 0 : i32
    %c0_i32_0 = arith.constant 0 : i32
    %c0_i32_1 = arith.constant 0 : i32
    return %c0_i32, %c0_i32_0 : i32, i32
  }
  func.func @transform_2(%arg0: i32, %arg1: i32) -> (i32, i32) {
    %c0_i32 = arith.constant 0 : i32
    %c0_i32_0 = arith.constant 0 : i32
    %c0_i32_1 = arith.constant 0 : i32
    return %c0_i32, %c0_i32_0 : i32, i32
  }
  func.func @transform_3(%arg0: i32, %arg1: i32) -> (i32, i32) {
    %c0_i32 = arith.constant 0 : i32
    %c0_i32_0 = arith.constant 0 : i32
    %c0_i32_1 = arith.constant 0 : i32
    return %c0_i32, %c0_i32_0 : i32, i32
  }
  func.func @transform_4(%arg0: i32, %arg1: i32) -> (i32, i32) {
    %c0_i32 = arith.constant 0 : i32
    %c0_i32_0 = arith.constant 0 : i32
    %c0_i32_1 = arith.constant 0 : i32
    return %c0_i32, %c0_i32_0 : i32, i32
  }
  func.func @transform_5(%arg0: i32, %arg1: i32) -> (i32, i32, i32) {
    %c0_i32 = arith.constant 0 : i32
    %c0_i32_0 = arith.constant 0 : i32
    return %arg0, %c0_i32, %arg1 : i32, i32, i32
  }
}

</mosaic_0001>

<bundles_post_ra>
// kernel: tpu_custom_call.1
= control target key start
LH: loop header
LB: loop body
LE: loop exit
PB: predicated region body
PF: predicated region fallthrough
CT: control target
= control target key end

     0   :  { %vm65_vm0 = vcmask 1043456   ;;  %vm52_vm1 = vcmask 31744   ;;  %v2740_v5 = vmov 0.0   ;;  %v2741_v23 = vmov 0   ;;  %s3088_s0 = inlined_call_operand.vmem [shape: f32[2,4,256], index: 0, kind: input, shape index: {}]   ;;  %s3089_s1 = inlined_call_operand.vmem [shape: f32[32,4], index: 1, kind: input, shape index: {}]   ;;  %s3090_s2 = inlined_call_operand.vmem [shape: f32[32,1], index: 2, kind: input, shape index: {}]   ;;  %s3091_s3 = inlined_call_operand.vmem [shape: f32[8,32], index: 3, kind: input, shape index: {}]   ;;  %s3092_s4 = inlined_call_operand.vmem [shape: f32[8,1], index: 4, kind: input, shape index: {}]   ;;  %s3093_s5 = inlined_call_operand.hbm [shape: f32[2,8,256], index: 5, kind: output, shape index: {}]  }
   0x1   :  { %v21_v0 = vld [vmem:[%s3088_s0] sm:$0xff]  ;;  %v23_v2 = vld [vmem:[%s3089_s1 + $0x8] sm:$0xff]  ;;  %136 = vmatprep.mubr.f32.mxu0 %v2740_v5  ;;  %v24_v8 = vld [vmem:[%s3089_s1 + $0x10] sm:$0xff]  ;;  %773 = vmatprep.mubr.f32.mxu1 %v2740_v5 }
   0x2   :  { %v22_v1 = vld [vmem:[%s3089_s1] sm:$0xff]  ;;  %v51_v3 = vcombine.high %v21_v0, %v21_v0  ;;  %v66_v4 = vsel %vm65_vm0, %v21_v0, 0  ;;  %v57_v7 = vsel %vm52_vm1, %v23_v2, 0  ;;  %v25_v9 = vld [vmem:[%s3089_s1 + $0x18] sm:$0xff]  ;;  %v60_v13 = vsel %vm52_vm1, %v24_v8, 0  ;;  %v28_v15 = vld [vmem:[%s3090_s2 + $0x10] sm:$0xff]  ;;  %2712 = vset.pattern.permute.xlu0 %v2741_v23  ;;  %2713 = vset.pattern.permute.xlu1 %v2741_v23 }
   0x3   :  { %v54_v6 = vsel %vm52_vm1, %v22_v1, 0  ;;  %v2795_v10 = vand.u32 4294901760, %v66_v4  ;;  %v2799_v12 = vand.u32 4294901760, %v57_v7  ;;  %v26_v14 = vld [vmem:[%s3090_s2] sm:$0xff]  ;;  %v2809_v17 = vand.u32 4294901760, %v60_v13 }
   0x4   :  { %v2797_v11 = vand.u32 4294901760, %v54_v6  ;;  %v68_v16 = vsel %vm65_vm0, %v51_v3, 0  ;;  %v63_v18 = vsel %vm52_vm1, %v25_v9, 0 }
   0x5   :  { %v2812_v19 = vand.u32 4294901760, %v68_v16  ;;  %v2815_v20 = vsub.f32 %v66_v4, %v2795_v10  ;;  %v2821_v22 = vsub.f32 %v57_v7, %v2799_v12 }
   0x6   :  { %v2818_v21 = vsub.f32 %v54_v6, %v2797_v11 }
   0x7   :  { %10 = vsyncpa [#allocation3], 0  ;;  %v2824_v24 = vsub.f32 %v60_v13, %v2809_v17  ;;  %v2826_v25 = vand.u32 4294901760, %v63_v18  ;;  %32 = vperm.xlu0 %2712, %v26_v14   ;;  %42 = vperm.xlu1 %2713, %v28_v15   ;;  %v2833_v27 = vand.u32 4294901760, %v2821_v22  ;;  %v182_v28 = vsub.f32 %v68_v16, %v2812_v19  ;;  %v27_v30 = vld [vmem:[%s3090_s2 + $0x8] sm:$0xff]  ;;  %v29_v31 = vld [vmem:[%s3090_s2 + $0x18] sm:$0xff] }
   0x8   :  { %71 = vmatprep.subr.mxu0 %v2812_v19  ;;  %v2830_v26 = vand.u32 4294901760, %v2818_v21  ;;  %v189_v29 = vand.u32 4294901760, %v2815_v20  ;;  %v691_v47 = vld [vmem:[%s3092_s4] sm:$0xff]  ;;  %vm697_vm2 = vcmask 261120  }
   0x9   :  { %73 = vmatpush1.msra.mxu0 %v2795_v10  ;;  %v2845_v32 = vand.u32 4294901760, %v2824_v24  ;;  %v2848_v33 = vsub.f32 %v63_v18, %v2826_v25  ;;  %v151_v35 = vsub.f32 %v2821_v22, %v2833_v27  ;;  %v183_v36 = vand.u32 4294901760, %v182_v28  ;;  %v690_v49 = vld [vmem:[%s3091_s3] sm:$0xff] }
   0xa   :  { %v140_v34 = vsub.f32 %v2818_v21, %v2830_v26  ;;  %v190_v37 = vsub.f32 %v2815_v20, %v189_v29  ;;  %v699_v50 = vsel %vm697_vm2, %v690_v49, 0 }
   0xb   :  { %37 = vperm.xlu0 %2712, %v27_v30   ;;  %47 = vperm.xlu1 %2713, %v29_v31   ;;  %v184_v39 = vsub.f32 %v182_v28, %v183_v36  ;;  %v2858_v41 = vand.u32 4294901760, %v151_v35  ;;  %v162_v43 = vsub.f32 %v2824_v24, %v2845_v32  ;;  %v2863_v44 = vand.u32 4294901760, %v2848_v33 }
   0xc   :  { %v2855_v38 = vand.u32 4294901760, %v140_v34  ;;  %v191_v40 = vand.u32 4294901760, %v190_v37  ;;  %v2929_v52 = vand.u32 4294901760, %v699_v50 }
   0xd   :  { %v185_v42 = vand.u32 4294901760, %v184_v39  ;;  %v2867_v45 = vand.u32 4294901760, %v162_v43  ;;  %v173_v46 = vsub.f32 %v2848_v33, %v2863_v44 }
   0xe   :  { %142 = vmatmul.mubr.f32.vlgmr.msra.gmra.mrb[0].mxu0 %v2855_v38  ;;  %v2932_v57 = vsub.f32 %v699_v50, %v2929_v52 }
   0xf   :  { %147 = vmatprep.mubr.f32.mxu0 %v2740_v5  ;;  %1260 = vperm.xlu0 %2712, %v26_v14   ;;  %v2876_v48 = vand.u32 4294901760, %v173_v46 }
  0x10   :  { %186 = vmatprep.subr.mxu0 %v185_v42  ;;  %1265 = vperm.xlu1 %2713, %v27_v30   ;;  %v2935_v4 = vand.u32 4294901760, %v2932_v57 }
  0x11   :  { %192 = vmatpush1.msra.mxu0 %v191_v40 }
  0x12   :  { %153 = vmatmul.mubr.f32.gmra.mrb[2].mxu0 %v2858_v41  ;;  %286 = vmatprep.subr.mxu0 %v182_v28  ;;  %v777_v23 = vsub.f32 %v2932_v57, %v2935_v4 }
  0x13   :  { %158 = vmatprep.mubr.f32.mxu0 %v2740_v5  ;;  %1270 = vperm.xlu0 %2712, %v28_v15  }
  0x14   :  { %1275 = vperm.xlu1 %2713, %v29_v31  }
  0x16   :  { %164 = vmatmul.mubr.f32.gmra.mrb[4].mxu0 %v2867_v45 }
  0x17   :  { %169 = vmatprep.mubr.f32.mxu0 %v2740_v5  ;;  %694 = vperm.xlu0 %2712, %v691_v47  }
  0x18   :  { %1920 = vperm.xlu1 %2713, %v691_v47  }
  0x1a   :  { %175 = vmatmul.mubr.f32.gmra.mrb[6].mxu0 %v2876_v48 }
  0x1b   :  { %255 = vmatprep.mubr.f32.mxu0 %v2740_v5 }
  0x1e   :  { %257 = vmatmul.mubr.f32.vlgmr.msra.gmra.mrb[0].mxu0 %v2797_v11 }
  0x1f   :  { %262 = vmatprep.mubr.f32.mxu0 %v2740_v5  ;;  %289 = vmatpush1.msra.mxu0 %v2815_v20 }
  0x20   :  { %386 = vmatprep.subr.mxu0 %v2812_v19 }
  0x22   :  { %264 = vmatmul.mubr.f32.gmra.mrb[2].mxu0 %v2799_v12 }
  0x23   :  { %269 = vmatprep.mubr.f32.mxu0 %v2740_v5 }
  0x26   :  { %271 = vmatmul.mubr.f32.gmra.mrb[4].mxu0 %v2809_v17 }
  0x27   :  { %276 = vmatprep.mubr.f32.mxu0 %v2740_v5 }
  0x2a   :  { %278 = vmatmul.mubr.f32.gmra.mrb[6].mxu0 %v2826_v25 }
  0x2b   :  { %352 = vmatprep.mubr.f32.mxu0 %v2740_v5 }
  0x2e   :  { %355 = vmatmul.mubr.f32.vlgmr.msra.gmra.mrb[0].mxu0 %v2818_v21 }
  0x2f   :  { %360 = vmatprep.mubr.f32.mxu0 %v2740_v5  ;;  %388 = vmatpush1.msra.mxu0 %v2795_v10 }
  0x30   :  { %491 = vmatprep.subr.mxu0 %v183_v36 }
  0x32   :  { %363 = vmatmul.mubr.f32.gmra.mrb[2].mxu0 %v2821_v22 }
  0x33   :  { %368 = vmatprep.mubr.f32.mxu0 %v2740_v5 }
  0x36   :  { %371 = vmatmul.mubr.f32.gmra.mrb[4].mxu0 %v2824_v24 }
  0x37   :  { %376 = vmatprep.mubr.f32.mxu0 %v2740_v5 }
  0x3a   :  { %379 = vmatmul.mubr.f32.gmra.mrb[6].mxu0 %v2848_v33 }
  0x3b   :  { %451 = vmatprep.mubr.f32.mxu0 %v2740_v5 }
  0x3e   :  { %455 = vmatmul.mubr.f32.vlgmr.msra.gmra.mrb[0].mxu0 %v2830_v26 }
  0x3f   :  { %460 = vmatprep.mubr.f32.mxu0 %v2740_v5  ;;  %495 = vmatpush1.msra.mxu0 %v189_v29 }
  0x40   :  { %588 = vmatprep.subr.mxu0 %v2812_v19 }
  0x42   :  { %464 = vmatmul.mubr.f32.gmra.mrb[2].mxu0 %v2833_v27 }
  0x43   :  { %469 = vmatprep.mubr.f32.mxu0 %v2740_v5 }
  0x46   :  { %473 = vmatmul.mubr.f32.gmra.mrb[4].mxu0 %v2845_v32 }
  0x47   :  { %478 = vmatprep.mubr.f32.mxu0 %v2740_v5 }
  0x4a   :  { %482 = vmatmul.mubr.f32.gmra.mrb[6].mxu0 %v2863_v44 }
  0x4b   :  { %558 = vmatprep.mubr.f32.mxu0 %v2740_v5 }
  0x4e   :  { %560 = vmatmul.mubr.f32.vlgmr.msra.gmra.mrb[0].mxu0 %v2797_v11 }
  0x4f   :  { %565 = vmatprep.mubr.f32.mxu0 %v2740_v5  ;;  %590 = vmatpush1.msra.mxu0 %v2795_v10 }
  0x52   :  { %567 = vmatmul.mubr.f32.gmra.mrb[2].mxu0 %v2799_v12 }
  0x53   :  { %572 = vmatprep.mubr.f32.mxu0 %v2740_v5 }
  0x56   :  { %574 = vmatmul.mubr.f32.gmra.mrb[4].mxu0 %v2809_v17 }
  0x57   :  { %579 = vmatprep.mubr.f32.mxu0 %v2740_v5 }
  0x5a   :  { %581 = vmatmul.mubr.f32.gmra.mrb[6].mxu0 %v2826_v25 }
  0x5b   :  { %653 = vmatprep.mubr.f32.mxu0 %v2740_v5 }
  0x5e   :  { %655 = vmatmul.mubr.f32.vlgmr.msra.gmra.mrb[0].mxu0 %v2797_v11 }
  0x5f   :  { %660 = vmatprep.mubr.f32.mxu0 %v2740_v5 }
  0x62   :  { %662 = vmatmul.mubr.f32.gmra.mrb[2].mxu0 %v2799_v12 }
  0x63   :  { %667 = vmatprep.mubr.f32.mxu0 %v2740_v5 }
  0x66   :  { %669 = vmatmul.mubr.f32.gmra.mrb[4].mxu0 %v2809_v17 }
  0x67   :  { %674 = vmatprep.mubr.f32.mxu0 %v2740_v5 }
  0x6a   :  { %676 = vmatmul.mubr.f32.gmra.mrb[6].mxu0 %v2826_v25 }
  0x6b   :  { %1998 = vmatprep.mubr.f32.mxu0 %v2740_v5 }
  0x86   :  { %v33_v51 = vpop.permute.xlu0 %32  ;;  %v43_v1 = vpop.permute.xlu1 %42 }
  0x8a   :  { %v38_v59 = vpop.permute.xlu0 %37  ;;  %v48_v34 = vpop.permute.xlu1 %47 }
 0x131   :  { %v656_v53 = vpop.f32.mrb[0].mxu0 }
 0x132   :  { %v2587_v54 = vadd.f32 %v656_v53, %v33_v51  ;;  %v658_v55 = vpop.f32.mrb[1].mxu0 }
 0x133   :  { %v2588_v56 = vadd.f32 %v658_v55, %v33_v51 }
 0x134   :  { %v682_v58 = vmax.f32 %v2587_v54, 0.0 }
 0x135   :  { %v683_v60 = vmax.f32 %v2588_v56, 0.0  ;;  %v663_v61 = vpop.f32.mrb[2].mxu0 }
 0x136   :  { %v703_v62 = vand.u32 4294901760, %v682_v58  ;;  %v2589_v63 = vadd.f32 %v663_v61, %v38_v59  ;;  %v665_v0 = vpop.f32.mrb[3].mxu0 }
 0x137   :  { %v701_v2 = vand.u32 4294901760, %v683_v60  ;;  %v2590_v3 = vadd.f32 %v665_v0, %v38_v59 }
 0x138   :  { %v2937_v6 = vsub.f32 %v682_v58, %v703_v62  ;;  %v684_v7 = vmax.f32 %v2589_v63, 0.0 }
 0x139   :  { %v2939_v8 = vsub.f32 %v683_v60, %v701_v2  ;;  %v685_v9 = vmax.f32 %v2590_v3, 0.0  ;;  %v670_v10 = vpop.f32.mrb[4].mxu0 }
 0x13a   :  { %v793_v13 = vand.u32 4294901760, %v2937_v6  ;;  %v707_v14 = vand.u32 4294901760, %v684_v7  ;;  %v2591_v15 = vadd.f32 %v670_v10, %v43_v1  ;;  %v672_v16 = vpop.f32.mrb[5].mxu0 }
 0x13b   :  { %v787_v18 = vand.u32 4294901760, %v2939_v8  ;;  %v705_v19 = vand.u32 4294901760, %v685_v9  ;;  %v2592_v20 = vadd.f32 %v672_v16, %v43_v1 }
 0x13c   :  { %v794_v28 = vsub.f32 %v2937_v6, %v793_v13  ;;  %v2946_v29 = vsub.f32 %v684_v7, %v707_v14  ;;  %v686_v30 = vmax.f32 %v2591_v15, 0.0  ;;  %v2948_v31 = vpack.c.bf16 %v707_v14, %v703_v62 }
 0x13d   :  { %v2950_v35 = vsub.f32 %v685_v9, %v705_v19  ;;  %v687_v36 = vmax.f32 %v2592_v20, 0.0  ;;  %v677_v37 = vpop.f32.mrb[6].mxu0  ;;  %v2952_v39 = vpack.c.bf16 %v705_v19, %v701_v2  ;;  %v788_v40 = vsub.f32 %v2939_v8, %v787_v18 }
 0x13e   :  { %v795_v42 = vand.u32 4294901760, %v794_v28  ;;  %v805_v43 = vand.u32 4294901760, %v2946_v29  ;;  %v711_v46 = vand.u32 4294901760, %v686_v30  ;;  %v2593_v47 = vadd.f32 %v677_v37, %v48_v34  ;;  %v679_v49 = vpop.f32.mrb[7].mxu0 }
 0x13f   :  { %v799_v50 = vand.u32 4294901760, %v2950_v35  ;;  %v709_v51 = vand.u32 4294901760, %v687_v36  ;;  %v2594_v53 = vadd.f32 %v679_v49, %v48_v34  ;;  %2492 = vmatprep.subr.bf16.mxu1 %v2952_v39  ;;  %v789_v54 = vand.u32 4294901760, %v788_v40 }
 0x140   :  { %v806_v55 = vsub.f32 %v2946_v29, %v805_v43  ;;  %v816_v56 = vsub.f32 %v686_v30, %v711_v46  ;;  %v688_v58 = vmax.f32 %v2593_v47, 0.0  ;;  %2494 = vmatpush1.bf16.msra.mxu1 %v2948_v31  ;;  %v2507_v59 = vpack.c.bf16 %v2950_v35, %v2939_v8 }
 0x141   :  { %v810_v60 = vsub.f32 %v687_v36, %v709_v51  ;;  %v689_v61 = vmax.f32 %v2594_v53, 0.0  ;;  %v800_v62 = vsub.f32 %v2950_v35, %v799_v50  ;;  %v2509_v63 = vpack.c.bf16 %v2946_v29, %v2937_v6 }
 0x142   :  { %v807_v0 = vand.u32 4294901760, %v806_v55  ;;  %v817_v1 = vand.u32 4294901760, %v816_v56  ;;  %v715_v2 = vand.u32 4294901760, %v688_v58  ;;  %v2523_v3 = vpack.c.bf16 %v799_v50, %v787_v18 }
 0x143   :  { %v811_v7 = vand.u32 4294901760, %v810_v60  ;;  %v713_v9 = vand.u32 4294901760, %v689_v61  ;;  %v801_v10 = vand.u32 4294901760, %v800_v62  ;;  %v2525_v14 = vpack.c.bf16 %v805_v43, %v793_v13 }
 0x144   :  { %v828_v15 = vsub.f32 %v688_v58, %v715_v2  ;;  %v2965_v16 = vpack.c.bf16 %v715_v2, %v711_v46  ;;  %v2501_v19 = vpack.c.bf16 %v807_v0, %v795_v42  ;;  %v818_v30 = vsub.f32 %v816_v56, %v817_v1 }
 0x145   :  { %v822_v8 = vsub.f32 %v689_v61, %v713_v9  ;;  %v2495_v20 = vpack.c.bf16 %v713_v9, %v709_v51  ;;  %v2499_v28 = vpack.c.bf16 %v801_v10, %v789_v54  ;;  %v2967_v6 = vand.u32 4294901760, %v777_v23  ;;  %v2490_v51 = vld [vmem:[%s3088_s0 + $0x8] sm:$0xff]  ;;  %s2742_s0 = smov [#allocation2]  }
 0x146   :  { %v829_v34 = vand.u32 4294901760, %v828_v15  ;;  %v2513_v35 = vpack.c.bf16 %v828_v15, %v816_v56  ;;  %v812_v29 = vsub.f32 %v810_v60, %v811_v7  ;;  %v819_v42 = vand.u32 4294901760, %v818_v30  ;;  %s2479_s13 = sshll.u32 %s2742_s0, 4  ;;  %s2480_s13 = int_to_ptr.vmem [resolvable:$true] %s2479_s13 }
 0x147   :  { %v823_v36 = vand.u32 4294901760, %v822_v8  ;;  %2496 = vmatprep.subr.bf16.mxu1 %v2495_v20  ;;  %v2511_v18 = vpack.c.bf16 %v822_v8, %v810_v60  ;;  %v1279_v53 = vcombine.high %v2490_v51, %v2490_v51  ;;  %v1292_v56 = vsel %vm65_vm0, %v2490_v51, 0  ;;  %s2716_s14 = scalar_lea.vmem %s2480_s13, 512  ;;  %p2721_p1 = scmp.lt.s32.totalorder %s2480_s13, %s2480_s13 }
 0x148   :  { %v830_v37 = vsub.f32 %v828_v15, %v829_v34  ;;  %2498 = vmatpush1.bf16.msra.mxu1 %v2965_v16  ;;  %v2529_v13 = vpack.c.bf16 %v829_v34, %v817_v1  ;;  %v813_v47 = vand.u32 4294901760, %v812_v29  ;;  %p2717_p0 = scmp.ne.s32.totalorder %s2480_s13, %s2716_s14  ;;  %p2722_p2 = scmp.lt.s32.totalorder %s2716_s14, %s2716_s14 }
 0x149   :  { %2500 = vmatprep.subr.bf16.mxu1 %v2499_v28  ;;  %v824_v40 = vsub.f32 %v822_v8, %v823_v36  ;;  %v2527_v43 = vpack.c.bf16 %v823_v36, %v811_v7  ;;  %v1294_v54 = vsel %vm65_vm0, %v1279_v53, 0 }
 0x14a   :  { %v831_v46 = vand.u32 4294901760, %v830_v37  ;;  %v1296_v55 = vand.u32 4294901760, %v1294_v54  ;;  %p2723_p3 = por %p2722_p2, %p2721_p1 }
 0x14b   :  { %779 = vmatmul.mubr.f32.vlgmr.msra.gmra.mrb[0].mxu1 %v2967_v6  ;;  %v825_v49 = vand.u32 4294901760, %v824_v40 }
 0x14c   :  { %2502 = vmatpush1.bf16.msra.mxu1 %v2501_v19  ;;  %v2505_v50 = vpack.c.bf16 %v831_v46, %v819_v42  ;;  %889 = vmatprep.mubr.f32.mxu1 %v2740_v5  ;;  %v1408_v58 = vsub.f32 %v1294_v54, %v1296_v55  ;;  %p2724_p4 = pnand %p2723_p3, %p2717_p0 }
 0x14d   :  { %v2503_v23 = vpack.c.bf16 %v825_v49, %v813_v47 }
 0x14e   :  { %v1409_v61 = vand.u32 4294901760, %v1408_v58 }
 0x14f   :  { %2504 = vmatprep.subr.bf16.mxu1 %v2503_v23 }
 0x150   :  { %2506 = vmatpush1.bf16.msra.mxu1 %v2505_v50 }
 0x151   :  { %2508 = vmatprep.subr.bf16.mxu1 %v2507_v59  ;;  %v1298_v59 = vand.u32 4294901760, %v1292_v56 }
 0x153   :  { %891 = vmatmul.mubr.f32.vlgmr.msra.gmra.mrb[0].mxu1 %v2929_v52  ;;  %v1414_v60 = vsub.f32 %v1292_v56, %v1298_v59 }
 0x154   :  { %2510 = vmatpush1.bf16.msra.mxu1 %v2509_v63  ;;  %977 = vmatprep.mubr.f32.mxu1 %v2740_v5  ;;  %v1410_v63 = vsub.f32 %v1408_v58, %v1409_v61 }
 0x155   :  { %2512 = vmatprep.subr.bf16.mxu1 %v2511_v18  ;;  %v1415_v62 = vand.u32 4294901760, %v1414_v60 }
 0x156   :  { %v1411_v1 = vand.u32 4294901760, %v1410_v63 }
 0x157   :  { %v1416_v0 = vsub.f32 %v1414_v60, %v1415_v62 }
 0x158   :  { %2514 = vmatpush1.bf16.msra.mxu1 %v2513_v35 }
 0x159   :  { %2516 = vmatprep.subr.bf16.mxu1 %v2952_v39 }
 0x15b   :  { %980 = vmatmul.mubr.f32.vlgmr.msra.gmra.mrb[0].mxu1 %v2932_v57 }
 0x15c   :  { %2518 = vmatpush1.bf16.msra.mxu1 %v2948_v31  ;;  %1058 = vmatprep.mubr.f32.mxu1 %v2740_v5 }
 0x15d   :  { %2520 = vmatprep.subr.bf16.mxu1 %v2495_v20 }
 0x160   :  { %2522 = vmatpush1.bf16.msra.mxu1 %v2965_v16 }
 0x161   :  { %2524 = vmatprep.subr.bf16.mxu1 %v2523_v3 }
 0x163   :  { %1062 = vmatmul.mubr.f32.vlgmr.msra.gmra.mrb[0].mxu1 %v2935_v4 }
 0x164   :  { %2526 = vmatpush1.bf16.msra.mxu1 %v2525_v14  ;;  %1156 = vmatprep.mubr.f32.mxu1 %v2740_v5 }
 0x165   :  { %2528 = vmatprep.subr.bf16.mxu1 %v2527_v43 }
 0x168   :  { %2530 = vmatpush1.bf16.msra.mxu1 %v2529_v13 }
 0x169   :  { %2532 = vmatprep.subr.bf16.mxu1 %v2952_v39  ;;  %v1417_v39 = vand.u32 4294901760, %v1416_v0 }
 0x16b   :  { %1158 = vmatmul.mubr.f32.vlgmr.msra.gmra.mrb[0].mxu1 %v2929_v52 }
 0x16c   :  { %2534 = vmatpush1.bf16.msra.mxu1 %v2948_v31  ;;  %1236 = vmatprep.mubr.f32.mxu1 %v2740_v5 }
 0x16d   :  { %2536 = vmatprep.subr.bf16.mxu1 %v2495_v20 }
 0x170   :  { %2538 = vmatpush1.bf16.msra.mxu1 %v2965_v16 }
 0x171   :  { %1297 = vmatprep.subr.mxu1 %v1296_v55 }
 0x173   :  { %1238 = vmatmul.mubr.f32.vlgmr.msra.gmra.mrb[0].mxu1 %v2929_v52 }
 0x174   :  { %1299 = vmatpush1.msra.mxu1 %v1298_v59  ;;  %1362 = vmatprep.mubr.f32.mxu1 %v2740_v5 }
 0x175   :  { %1412 = vmatprep.subr.mxu1 %v1411_v1 }
 0x177   :  { %1368 = vmatmul.mubr.f32.vlgmr.msra.gmra.mrb[2].mxu1 %v2855_v38 }
 0x178   :  { %1373 = vmatprep.mubr.f32.mxu1 %v2740_v5  ;;  %1418 = vmatpush1.msra.mxu1 %v1417_v39 }
 0x179   :  { %1512 = vmatprep.subr.mxu1 %v1408_v58 }
 0x17b   :  { %1379 = vmatmul.mubr.f32.gmra.mrb[4].mxu1 %v2858_v41 }
 0x17c   :  { %1384 = vmatprep.mubr.f32.mxu1 %v2740_v5 }
 0x17f   :  { %1390 = vmatmul.mubr.f32.gmra.mrb[6].mxu1 %v2867_v45 }
 0x180   :  { %1395 = vmatprep.mubr.f32.mxu1 %v2740_v5 }
 0x183   :  { %1401 = vmatmul.mubr.f32.gmra.mrb[8].mxu1 %v2876_v48  ;;  %v1266_v48 = vpop.permute.xlu1 %1265 }
 0x184   :  { %1481 = vmatprep.mubr.f32.mxu1 %v2740_v5 }
 0x187   :  { %1483 = vmatmul.mubr.f32.vlgmr.msra.gmra.mrb[2].mxu1 %v2797_v11  ;;  %v1276_v43 = vpop.permute.xlu1 %1275 }
 0x188   :  { %1488 = vmatprep.mubr.f32.mxu1 %v2740_v5  ;;  %1515 = vmatpush1.msra.mxu1 %v1414_v60 }
 0x189   :  { %1612 = vmatprep.subr.mxu1 %v1296_v55 }
 0x18b   :  { %1490 = vmatmul.mubr.f32.gmra.mrb[4].mxu1 %v2799_v12 }
 0x18c   :  { %1495 = vmatprep.mubr.f32.mxu1 %v2740_v5 }
 0x18f   :  { %1497 = vmatmul.mubr.f32.gmra.mrb[6].mxu1 %v2809_v17 }
 0x190   :  { %1502 = vmatprep.mubr.f32.mxu1 %v2740_v5 }
 0x193   :  { %1504 = vmatmul.mubr.f32.gmra.mrb[8].mxu1 %v2826_v25 }
 0x194   :  { %1578 = vmatprep.mubr.f32.mxu1 %v2740_v5 }
 0x197   :  { %1581 = vmatmul.mubr.f32.vlgmr.msra.gmra.mrb[2].mxu1 %v2818_v21  ;;  %v1261_v21 = vpop.permute.xlu0 %1260 }
 0x198   :  { %1586 = vmatprep.mubr.f32.mxu1 %v2740_v5  ;;  %1614 = vmatpush1.msra.mxu1 %v1298_v59 }
 0x199   :  { %1717 = vmatprep.subr.mxu1 %v1409_v61 }
 0x19b   :  { %1589 = vmatmul.mubr.f32.gmra.mrb[4].mxu1 %v2821_v22  ;;  %v1271_v22 = vpop.permute.xlu0 %1270 }
 0x19c   :  { %1594 = vmatprep.mubr.f32.mxu1 %v2740_v5 }
 0x19f   :  { %1597 = vmatmul.mubr.f32.gmra.mrb[6].mxu1 %v2824_v24  ;;  %v695_v24 = vpop.permute.xlu0 %694 }
 0x1a0   :  { %1602 = vmatprep.mubr.f32.mxu1 %v2740_v5 }
 0x1a3   :  { %1605 = vmatmul.mubr.f32.gmra.mrb[8].mxu1 %v2848_v33 }
 0x1a4   :  { %1677 = vmatprep.mubr.f32.mxu1 %v2740_v5 }
 0x1a7   :  { %1681 = vmatmul.mubr.f32.vlgmr.msra.gmra.mrb[2].mxu1 %v2830_v26 }
 0x1a8   :  { %1686 = vmatprep.mubr.f32.mxu1 %v2740_v5  ;;  %1721 = vmatpush1.msra.mxu1 %v1415_v62 }
 0x1a9   :  { %1814 = vmatprep.subr.mxu1 %v1296_v55 }
 0x1ab   :  { %1690 = vmatmul.mubr.f32.gmra.mrb[4].mxu1 %v2833_v27 }
 0x1ac   :  { %1695 = vmatprep.mubr.f32.mxu1 %v2740_v5 }
 0x1af   :  { %1699 = vmatmul.mubr.f32.gmra.mrb[6].mxu1 %v2845_v32 }
 0x1b0   :  { %1704 = vmatprep.mubr.f32.mxu1 %v2740_v5 }
 0x1b3   :  { %1708 = vmatmul.mubr.f32.gmra.mrb[8].mxu1 %v2863_v44 }
 0x1b4   :  { %1784 = vmatprep.mubr.f32.mxu1 %v2740_v5 }
 0x1b7   :  { %1786 = vmatmul.mubr.f32.vlgmr.msra.gmra.mrb[2].mxu1 %v2797_v11 }
 0x1b8   :  { %1791 = vmatprep.mubr.f32.mxu1 %v2740_v5  ;;  %1816 = vmatpush1.msra.mxu1 %v1298_v59 }
 0x1bb   :  { %1793 = vmatmul.mubr.f32.gmra.mrb[4].mxu1 %v2799_v12 }
 0x1bc   :  { %1798 = vmatprep.mubr.f32.mxu1 %v2740_v5 }
 0x1bf   :  { %1800 = vmatmul.mubr.f32.gmra.mrb[6].mxu1 %v2809_v17 }
 0x1c0   :  { %1805 = vmatprep.mubr.f32.mxu1 %v2740_v5 }
 0x1c3   :  { %1807 = vmatmul.mubr.f32.gmra.mrb[8].mxu1 %v2826_v25 }
 0x1c4   :  { %1879 = vmatprep.mubr.f32.mxu1 %v2740_v5 }
 0x1c7   :  { %1881 = vmatmul.mubr.f32.vlgmr.msra.gmra.mrb[2].mxu1 %v2797_v11 }
 0x1c8   :  { %1886 = vmatprep.mubr.f32.mxu1 %v2740_v5 }
 0x1cb   :  { %1888 = vmatmul.mubr.f32.gmra.mrb[4].mxu1 %v2799_v12 }
 0x1cc   :  { %1893 = vmatprep.mubr.f32.mxu1 %v2740_v5 }
 0x1cf   :  { %1895 = vmatmul.mubr.f32.gmra.mrb[6].mxu1 %v2809_v17 }
 0x1d0   :  { %1900 = vmatprep.mubr.f32.mxu1 %v2740_v5 }
 0x1d3   :  { %1902 = vmatmul.mubr.f32.gmra.mrb[8].mxu1 %v2826_v25 }
 0x246   :  { %v1239_v26 = vpop.f32.mrb[0].mxu1 }
 0x247   :  { %v2595_v27 = vadd.f32 %v1239_v26, %v695_v24  ;;  %v1241_v32 = vpop.f32.mrb[1].mxu1 }
 0x248   :  { %v2596_v33 = vadd.f32 %v1241_v32, %v695_v24 }
 0x249   :  { %v1244_v11 = vmax.f32 %v2595_v27, 0.0 }
 0x24a   :  { %v1245_v38 = vmax.f32 %v2596_v33, 0.0 }
 0x24b   :  { %1246 = vst [vmem:[#allocation2] sm:$0xff] %v1244_v11 }
 0x24c   :  { %1247 = vst [vmem:[#allocation2 + $0x8] sm:$0xff] %v1245_v38 }
 0x29a   :  { %v1882_v12 = vpop.f32.mrb[2].mxu1 }
 0x29b   :  { %v2597_v41 = vadd.f32 %v1882_v12, %v1261_v21  ;;  %v1884_v44 = vpop.f32.mrb[3].mxu1 }
 0x29c   :  { %v2598_v45 = vadd.f32 %v1884_v44, %v1261_v21 }
 0x29d   :  { %v1908_v17 = vmax.f32 %v2597_v41, 0.0 }
 0x29e   :  { %v1909_v31 = vmax.f32 %v2598_v45, 0.0  ;;  %v1889_v2 = vpop.f32.mrb[4].mxu1 }
 0x29f   :  { %v1928_v25 = vand.u32 4294901760, %v1908_v17  ;;  %v2599_v3 = vadd.f32 %v1889_v2, %v1266_v48  ;;  %v1891_v7 = vpop.f32.mrb[5].mxu1 }
 0x2a0   :  { %v1926_v9 = vand.u32 4294901760, %v1909_v31  ;;  %v2600_v10 = vadd.f32 %v1891_v7, %v1266_v48 }
 0x2a1   :  { %v3040_v14 = vsub.f32 %v1908_v17, %v1928_v25  ;;  %v1910_v15 = vmax.f32 %v2599_v3, 0.0 }
 0x2a2   :  { %v3042_v16 = vsub.f32 %v1909_v31, %v1926_v9  ;;  %v1911_v19 = vmax.f32 %v2600_v10, 0.0  ;;  %v1896_v8 = vpop.f32.mrb[6].mxu1 }
 0x2a3   :  { %v2018_v20 = vand.u32 4294901760, %v3040_v14  ;;  %v1932_v28 = vand.u32 4294901760, %v1910_v15  ;;  %v2601_v30 = vadd.f32 %v1896_v8, %v1271_v22  ;;  %v1898_v34 = vpop.f32.mrb[7].mxu1 }
 0x2a4   :  { %v2012_v35 = vand.u32 4294901760, %v3042_v16  ;;  %v1930_v36 = vand.u32 4294901760, %v1911_v19  ;;  %v2602_v29 = vadd.f32 %v1898_v34, %v1271_v22 }
 0x2a5   :  { %v2019_v18 = vsub.f32 %v3040_v14, %v2018_v20  ;;  %v3047_v37 = vpack.c.bf16 %v1932_v28, %v1928_v25  ;;  %v3049_v13 = vsub.f32 %v1910_v15, %v1932_v28  ;;  %v1912_v40 = vmax.f32 %v2601_v30, 0.0 }
 0x2a6   :  { %v2023_v42 = vsub.f32 %v1911_v19, %v1930_v36  ;;  %v1913_v46 = vmax.f32 %v2602_v29, 0.0  ;;  %v1903_v47 = vpop.f32.mrb[8].mxu1  ;;  %v3051_v49 = vpack.c.bf16 %v1930_v36, %v1926_v9  ;;  %v2013_v50 = vsub.f32 %v3042_v16, %v2012_v35 }
 0x2a7   :  { %v2020_v23 = vand.u32 4294901760, %v2019_v18  ;;  %v2030_v51 = vand.u32 4294901760, %v3049_v13  ;;  %v1936_v53 = vand.u32 4294901760, %v1912_v40  ;;  %v2603_v54 = vadd.f32 %v1903_v47, %v1276_v43  ;;  %v1905_v55 = vpop.f32.mrb[9].mxu1 }
 0x2a8   :  { %v2024_v56 = vand.u32 4294901760, %v2023_v42  ;;  %v1934_v58 = vand.u32 4294901760, %v1913_v46  ;;  %v2604_v59 = vadd.f32 %v1905_v55, %v1276_v43  ;;  %2540 = vmatprep.subr.bf16.mxu0 %v3051_v49  ;;  %v2014_v60 = vand.u32 4294901760, %v2013_v50 }
 0x2a9   :  { %v2031_v61 = vsub.f32 %v3049_v13, %v2030_v51  ;;  %v2041_v62 = vsub.f32 %v1912_v40, %v1936_v53  ;;  %v1914_v63 = vmax.f32 %v2603_v54, 0.0  ;;  %2542 = vmatpush1.bf16.msra.mxu0 %v3047_v37  ;;  %v2555_v0 = vpack.c.bf16 %v2023_v42, %v3042_v16 }
 0x2aa   :  { %v2035_v1 = vsub.f32 %v1913_v46, %v1934_v58  ;;  %v1915_v39 = vmax.f32 %v2604_v59, 0.0  ;;  %v2025_v21 = vsub.f32 %v2023_v42, %v2024_v56  ;;  %v2557_v22 = vpack.c.bf16 %v3049_v13, %v3040_v14 }
 0x2ab   :  { %v2032_v24 = vand.u32 4294901760, %v2031_v61  ;;  %v2042_v26 = vand.u32 4294901760, %v2041_v62  ;;  %v1940_v27 = vand.u32 4294901760, %v1914_v63  ;;  %v2571_v32 = vpack.c.bf16 %v2024_v56, %v2012_v35 }
 0x2ac   :  { %v2036_v33 = vand.u32 4294901760, %v2035_v1  ;;  %v1938_v11 = vand.u32 4294901760, %v1915_v39  ;;  %v2026_v38 = vand.u32 4294901760, %v2025_v21  ;;  %v2573_v12 = vpack.c.bf16 %v2030_v51, %v2018_v20 }
 0x2ad   :  { %v2545_v41 = vpack.c.bf16 %v1940_v27, %v1936_v53  ;;  %v2053_v44 = vsub.f32 %v1914_v63, %v1940_v27  ;;  %v2549_v45 = vpack.c.bf16 %v2032_v24, %v2020_v23  ;;  %v2043_v2 = vsub.f32 %v2041_v62, %v2042_v26 }
 0x2ae   :  { %v2047_v17 = vsub.f32 %v1915_v39, %v1938_v11  ;;  %v2543_v48 = vpack.c.bf16 %v1938_v11, %v1934_v58  ;;  %v2547_v31 = vpack.c.bf16 %v2026_v38, %v2014_v60  ;;  %v2037_v9 = vsub.f32 %v2035_v1, %v2036_v33 }
 0x2af   :  { %v2054_v25 = vand.u32 4294901760, %v2053_v44  ;;  %v2561_v3 = vpack.c.bf16 %v2053_v44, %v2041_v62  ;;  %v2044_v8 = vand.u32 4294901760, %v2043_v2 }
 0x2b0   :  { %v2048_v7 = vand.u32 4294901760, %v2047_v17  ;;  %2544 = vmatprep.subr.bf16.mxu0 %v2543_v48  ;;  %v2559_v10 = vpack.c.bf16 %v2047_v17, %v2035_v1  ;;  %v2038_v28 = vand.u32 4294901760, %v2037_v9 }
 0x2b1   :  { %v2055_v14 = vsub.f32 %v2053_v44, %v2054_v25  ;;  %2546 = vmatpush1.bf16.msra.mxu0 %v2545_v41  ;;  %v2577_v15 = vpack.c.bf16 %v2054_v25, %v2042_v26 }
 0x2b2   :  { %2548 = vmatprep.subr.bf16.mxu0 %v2547_v31  ;;  %v2049_v16 = vsub.f32 %v2047_v17, %v2048_v7  ;;  %v2575_v19 = vpack.c.bf16 %v2048_v7, %v2036_v33 }
 0x2b3   :  { %v2056_v20 = vand.u32 4294901760, %v2055_v14 }
 0x2b4   :  { %2004 = vmatmul.mubr.f32.vlgmr.msra.gmra.mrb[8].mxu0 %v2967_v6  ;;  %v2050_v30 = vand.u32 4294901760, %v2049_v16 }
 0x2b5   :  { %2550 = vmatpush1.bf16.msra.mxu0 %v2549_v45  ;;  %v2553_v34 = vpack.c.bf16 %v2056_v20, %v2044_v8  ;;  %2114 = vmatprep.mubr.f32.mxu0 %v2740_v5 }
 0x2b6   :  { %v2551_v35 = vpack.c.bf16 %v2050_v30, %v2038_v28 }
 0x2b8   :  { %2552 = vmatprep.subr.bf16.mxu0 %v2551_v35 }
 0x2b9   :  { %2554 = vmatpush1.bf16.msra.mxu0 %v2553_v34 }
 0x2ba   :  { %2556 = vmatprep.subr.bf16.mxu0 %v2555_v0 }
 0x2bc   :  { %2116 = vmatmul.mubr.f32.vlgmr.msra.gmra.mrb[8].mxu0 %v2929_v52 }
 0x2bd   :  { %2558 = vmatpush1.bf16.msra.mxu0 %v2557_v22  ;;  %2202 = vmatprep.mubr.f32.mxu0 %v2740_v5 }
 0x2be   :  { %2560 = vmatprep.subr.bf16.mxu0 %v2559_v10 }
 0x2c1   :  { %2562 = vmatpush1.bf16.msra.mxu0 %v2561_v3 }
 0x2c2   :  { %2564 = vmatprep.subr.bf16.mxu0 %v3051_v49 }
 0x2c4   :  { %2205 = vmatmul.mubr.f32.vlgmr.msra.gmra.mrb[8].mxu0 %v2932_v57  ;;  %v1921_v57 = vpop.permute.xlu1 %1920 }
 0x2c5   :  { %2566 = vmatpush1.bf16.msra.mxu0 %v3047_v37  ;;  %2283 = vmatprep.mubr.f32.mxu0 %v2740_v5 }
 0x2c6   :  { %2568 = vmatprep.subr.bf16.mxu0 %v2543_v48 }
 0x2c9   :  { %2570 = vmatpush1.bf16.msra.mxu0 %v2545_v41 }
 0x2ca   :  { %2572 = vmatprep.subr.bf16.mxu0 %v2571_v32 }
 0x2cc   :  { %2287 = vmatmul.mubr.f32.vlgmr.msra.gmra.mrb[8].mxu0 %v2935_v4 }
 0x2cd   :  { %2574 = vmatpush1.bf16.msra.mxu0 %v2573_v12  ;;  %2381 = vmatprep.mubr.f32.mxu0 %v2740_v5 }
 0x2ce   :  { %2576 = vmatprep.subr.bf16.mxu0 %v2575_v19 }
 0x2d1   :  { %2578 = vmatpush1.bf16.msra.mxu0 %v2577_v15 }
 0x2d2   :  { %2580 = vmatprep.subr.bf16.mxu0 %v3051_v49 }
 0x2d4   :  { %2383 = vmatmul.mubr.f32.vlgmr.msra.gmra.mrb[8].mxu0 %v2929_v52 }
 0x2d5   :  { %2582 = vmatpush1.bf16.msra.mxu0 %v3047_v37  ;;  %2461 = vmatprep.mubr.f32.mxu0 %v2740_v5 }
 0x2d6   :  { %2584 = vmatprep.subr.bf16.mxu0 %v2543_v48 }
 0x2d9   :  { %2586 = vmatpush1.bf16.msra.mxu0 %v2545_v41 }
 0x2dc   :  { %2463 = vmatmul.mubr.f32.vlgmr.msra.gmra.mrb[8].mxu0 %v2929_v52 }
 0x3af   :  { %v2464_v6 = vpop.f32.mrb[8].mxu0 }
 0x3b0   :  { %v2605_v4 = vadd.f32 %v2464_v6, %v1921_v57  ;;  %v2466_v36 = vpop.f32.mrb[9].mxu0 }
 0x3b1   :  { %v2606_v29 = vadd.f32 %v2466_v36, %v1921_v57 }
 0x3b2   :  { %v2469_v18 = vmax.f32 %v2605_v4, 0.0 }
 0x3b3   :  { %v2470_v13 = vmax.f32 %v2606_v29, 0.0 }
 0x3b4   :  { %2472 = vst [vmem:[#allocation2 + $0x10] sm:$0xff] %v2469_v18 }
 0x3b5   :  { %2473 = vst [vmem:[#allocation2 + $0x18] sm:$0xff] %v2470_v13 }
 0x3b6   :  { %2727 = shalt.err (!%p2724_p4)
}
 0x3b7   :  { %s2728_s17 = scalar_lea.hbm %s3093_s5, 512 }
 0x3b8   :  { %p2729_p5 = scmp.ne.s32.totalorder %s3093_s5, %s2728_s17  ;;  %p2732_p6 = scmp.lt.u32.totalorder %s2728_s17, %s3093_s5 }
 0x3ba   :  { %p2734_p7 = pnand %p2732_p6, %p2729_p5 }
 0x3bc   :  { %2737 = shalt.err (!%p2734_p7)
}
 0x3bd   :  { %s2743_s22 = smov 256   ;;  %s2744_s23 = smov 16  }
 0x3be   :  { %2485 = dma.vmem_to_hbm [thread:$0]  %s2480_s13, 512, %s3093_s5, [#allocation3], %s2743_s22, %s2743_s22, %s2744_s23  }
 0x3bf   :  { %2738 = dma.done.wait [#allocation3], 512  }
 0x3c0   :  { %2739 = vsyncadd [#allocation3], 4294966784 }
 0x3c1   :  { %2489 = vsyncpa [#allocation3], 1 }

</bundles_post_ra>
